<compile_context>
chip_gen: v7x
topology: tpu7x:2x2x1
jax: 0.10.0
libtpu: 0.0.40
codegen_flags: <defaults>
</compile_context>

<pallas_src>
import jax
import jax.numpy as jnp
from jax.experimental import pallas as pl
from jax.experimental.pallas import tpu as pltpu


def _round_up(x, m):
    return (x + m - 1) // m * m


def _qnet_kernel(s_ref, a_ref, w1_ref, b1_ref, w2_ref, b2_ref, wq_ref, bq_ref,
                 out_ref, x_ref):
    S = s_ref.shape[1]
    A = a_ref.shape[1]
    # Fused fc1 input: zero-fill the (tb, K_pad) scratch every step (NaN-safe,
    # and correct even when the batch axis is sharded across TensorCores),
    # then place state / action in their lane ranges.  Padded lanes hit
    # zero-padded W1 rows, so they contribute nothing.
    x_ref[...] = jnp.zeros_like(x_ref)
    x_ref[:, 0:S] = s_ref[...].astype(x_ref.dtype)
    x_ref[:, S:S + A] = a_ref[...].astype(x_ref.dtype)
    # fc1: single K<=128 matmul, f32 accumulation.
    h1 = jnp.dot(x_ref[...], w1_ref[...], preferred_element_type=jnp.float32)
    h1 = jnp.maximum(h1 + b1_ref[...], 0.0)
    # fc2: (tb, F1) @ (F1, F2), f32 accumulation.
    h2 = jnp.dot(h1.astype(w2_ref.dtype), w2_ref[...],
                 preferred_element_type=jnp.float32) + b2_ref[...]
    h2 = jnp.maximum(h2, 0.0)
    # q head on VPU/XLU (all f32): row-broadcast multiply + lane reduction.
    q = jnp.sum(h2 * wq_ref[...], axis=-1, keepdims=True) + bq_ref[...]
    out_ref[...] = q.astype(out_ref.dtype)


def pack_params(params, state_dim, n_actions, *, fc1_pad=None, fc2_pad=None,
                dtype=jnp.bfloat16):
    """One-time packing: transpose weights to [in, out], combine W1's
    state/action halves into a single K-padded (128-row) block, zero-pad
    hidden dims to 128-lane multiples (300 -> 384, 400 -> 512), and pack the
    q head as a (1, F2) row for the in-kernel VPU reduction.  Matmul operands
    (W1, W2) are cast to `dtype` (bf16 by default; the kernel accumulates in
    f32); biases and the q row stay f32.  Zero padding is numerically free:
    padded biases are 0 so relu(0)=0, and the matching padded rows/columns of
    the next layer are 0."""
    w1, b1, w2, b2, wq, bq = params
    fc1 = w1.shape[0]
    fc2 = w2.shape[0]
    S, A = state_dim, n_actions
    assert w1.shape[1] == S + A
    f1p = fc1_pad or _round_up(fc1, 128)
    f2p = fc2_pad or _round_up(fc2, 128)
    kp = _round_up(S + A, 128)

    w1_t = jnp.asarray(w1, jnp.float32).T                       # [S+A, fc1]
    w1p = jnp.zeros((kp, f1p), jnp.float32).at[:S + A, :fc1].set(w1_t)
    b1p = jnp.zeros((1, f1p), jnp.float32).at[:, :fc1].set(
        jnp.asarray(b1, jnp.float32)[None, :])
    w2p = jnp.zeros((f1p, f2p), jnp.float32).at[:fc1, :fc2].set(
        jnp.asarray(w2, jnp.float32).T)
    b2p = jnp.zeros((1, f2p), jnp.float32).at[:, :fc2].set(
        jnp.asarray(b2, jnp.float32)[None, :])
    wqp = jnp.zeros((1, f2p), jnp.float32).at[:, :fc2].set(
        jnp.asarray(wq, jnp.float32).reshape(1, fc2))
    bqp = jnp.asarray(bq, jnp.float32).reshape(1, 1)

    cast = lambda x: x.astype(dtype)
    return (cast(w1p), b1p, cast(w2p), b2p, wqp, bqp)


def qnetwork_forward(state, action, packed_params, *, block_b=1024):
    """state: [B, S], action: [B, A], packed_params from pack_params().
    Returns q: [B, 1] float32.

    Partial last batch tiles rely on (a) this MLP being row-independent, so
    garbage padded input rows never mix into valid rows, and (b) Pallas
    masking out-of-range output rows on writeback.  A future cross-row op
    (e.g. batch norm over the batch) would break this assumption."""
    w1, b1, w2, b2, wq_row, bq = packed_params
    B, S = state.shape
    A = action.shape[1]
    K_pad, F1 = w1.shape
    F2 = w2.shape[1]
    assert S + A <= K_pad
    cdt = w1.dtype
    state = state.astype(cdt)
    action = action.astype(cdt)

    # Batch tile: multiple of 16 (safe for f32 and bf16 sublane packing),
    # capped by block_b, and sized so the grid has >= 2 steps whenever B
    # allows (v7x: two TensorCores via the "parallel" batch axis).
    half = (B + 1) // 2
    tb = max(16, min(_round_up(block_b, 16), _round_up(half, 16)))
    grid = (pl.cdiv(B, tb),)

    const = lambda shape: pl.BlockSpec(shape, lambda b: (0, 0))
    batched = lambda ncols: pl.BlockSpec((tb, ncols), lambda b: (b, 0))

    fn = pl.pallas_call(
        _qnet_kernel,
        out_shape=jax.ShapeDtypeStruct((B, 1), jnp.float32),
        grid_spec=pltpu.PrefetchScalarGridSpec(
            num_scalar_prefetch=0,
            grid=grid,
            in_specs=[
                batched(S),             # state   [B, S]
                batched(A),             # action  [B, A]
                const((K_pad, F1)),     # W1 combined, K-padded (VMEM-resident)
                const((1, F1)),         # b1 (f32)
                const((F1, F2)),        # W2
                const((1, F2)),         # b2 (f32)
                const((1, F2)),         # Wq row (f32)
                const((1, 1)),          # bq (f32)
            ],
            out_specs=batched(1),       # q [B, 1]
            scratch_shapes=[pltpu.VMEM((tb, K_pad), cdt)],
        ),
        compiler_params=pltpu.CompilerParams(
            dimension_semantics=("parallel",),
        ),
    )
    return fn(state, action, w1, b1, w2, b2, wq_row, bq)


def init_params(key, state_dim, n_actions, fc1_dims=300, fc2_dims=400):
    """Deterministic PyTorch-Linear-style init: U(-1/sqrt(fan_in), +1/sqrt(fan_in))."""
    def linear(k, fan_in, fan_out):
        kw, kb = jax.random.split(k)
        bound = 1.0 / jnp.sqrt(fan_in)
        w = jax.random.uniform(kw, (fan_out, fan_in), jnp.float32, -bound, bound)
        b = jax.random.uniform(kb, (fan_out,), jnp.float32, -bound, bound)
        return w, b

    k1, k2, k3 = jax.random.split(key, 3)
    w1, b1 = linear(k1, state_dim + n_actions, fc1_dims)
    w2, b2 = linear(k2, fc1_dims, fc2_dims)
    wq, bq = linear(k3, fc2_dims, 1)
    return (w1, b1, w2, b2, wq, bq)


def qnetwork_ref(state, action, params):
    """Pure-JAX reference matching the PyTorch forward (unpadded f32 params)."""
    w1, b1, w2, b2, wq, bq = params
    x = jnp.concatenate([state, action], axis=1)
    x = jax.nn.relu(x @ w1.T + b1)
    x = jax.nn.relu(x @ w2.T + b2)
    return x @ wq.T + bq


if __name__ == "__main__":
    key = jax.random.PRNGKey(0)
    k_s, k_a, k_p, k_s2, k_a2 = jax.random.split(key, 5)

    batch = 2
    state_dim = 8       # input_shape[0]
    n_actions = 2
    fc1_dims, fc2_dims = 300, 400  # module defaults

    params = init_params(k_p, state_dim, n_actions, fc1_dims, fc2_dims)
    packed_bf16 = pack_params(params, state_dim, n_actions)                    # default fast path
    packed_f32 = pack_params(params, state_dim, n_actions, dtype=jnp.float32)  # bit-faithful path

    state = jax.random.normal(k_s, (batch, state_dim), jnp.float32)
    action = jax.random.normal(k_a, (batch, n_actions), jnp.float32)
    q_ref = jax.block_until_ready(qnetwork_ref(state, action, params))

    # f32 packing: matches the PyTorch-style f32 reference tightly.
    q32 = jax.block_until_ready(qnetwork_forward(state, action, packed_f32))
    assert q32.shape == (batch, 1), q32.shape
    assert jnp.allclose(q32, q_ref, atol=1e-4, rtol=1e-4), (q32, q_ref)

    # bf16 packing (default fast path): f32 accumulation, looser tolerance.
    q16 = jax.block_until_ready(qnetwork_forward(state, action, packed_bf16))
    assert q16.shape == (batch, 1), q16.shape
    assert jnp.allclose(q16, q_ref, atol=3e-2, rtol=3e-2), (q16, q_ref)

    # Exercise the batch grid (multiple tiles + a partial last tile).
    b2_ = 160
    state2 = jax.random.normal(k_s2, (b2_, state_dim), jnp.float32)
    action2 = jax.random.normal(k_a2, (b2_, n_actions), jnp.float32)
    q2_ref = jax.block_until_ready(qnetwork_ref(state2, action2, params))
    q2_32 = jax.block_until_ready(
        qnetwork_forward(state2, action2, packed_f32, block_b=64))
    assert q2_32.shape == (b2_, 1), q2_32.shape
    assert jnp.allclose(q2_32, q2_ref, atol=1e-4, rtol=1e-4)
    q2_16 = jax.block_until_ready(
        qnetwork_forward(state2, action2, packed_bf16, block_b=64))
    assert jnp.allclose(q2_16, q2_ref, atol=3e-2, rtol=3e-2)

    print("KERNEL_OK")
</pallas_src>

<mosaic_0001>
module attributes {stable_mosaic.version = 11 : i64} {
  func.func @_qnet_kernel(%arg0: i32, %arg1: memref<16x8xf32, #tpu.memory_space<vmem>>, %arg2: memref<16x2xf32, #tpu.memory_space<vmem>>, %arg3: memref<128x384xf32, #tpu.memory_space<vmem>>, %arg4: memref<1x384xf32, #tpu.memory_space<vmem>>, %arg5: memref<384x512xf32, #tpu.memory_space<vmem>>, %arg6: memref<1x512xf32, #tpu.memory_space<vmem>>, %arg7: memref<1x512xf32, #tpu.memory_space<vmem>>, %arg8: memref<1x1xf32, #tpu.memory_space<vmem>>, %arg9: memref<16x1xf32, #tpu.memory_space<vmem>>, %arg10: memref<16x128xf32, #tpu.memory_space<vmem>>) attributes {dimension_semantics = [#tpu.dimension_semantics<parallel>], iteration_bounds = array<i64: 1>, scalar_prefetch = 0 : i64, scratch_operands = 1 : i64, tpu.core_type = #tpu.core_type<tc>, window_params = [{transform_indices = @transform_0, window_bounds = array<i64: 16, 8>}, {transform_indices = @transform_1, window_bounds = array<i64: 16, 2>}, {pipeline_mode = #tpu.pipeline_mode<synchronous>, transform_indices = @transform_2, window_bounds = array<i64: 128, 384>}, {pipeline_mode = #tpu.pipeline_mode<synchronous>, transform_indices = @transform_3, window_bounds = array<i64: 1, 384>}, {pipeline_mode = #tpu.pipeline_mode<synchronous>, transform_indices = @transform_4, window_bounds = array<i64: 384, 512>}, {pipeline_mode = #tpu.pipeline_mode<synchronous>, transform_indices = @transform_5, window_bounds = array<i64: 1, 512>}, {pipeline_mode = #tpu.pipeline_mode<synchronous>, transform_indices = @transform_6, window_bounds = array<i64: 1, 512>}, {pipeline_mode = #tpu.pipeline_mode<synchronous>, transform_indices = @transform_7, window_bounds = array<i64: 1, 1>}, {transform_indices = @transform_8, window_bounds = array<i64: 16, 1>}]} {
    %cst = arith.constant 0.000000e+00 : f32
    %0 = vector.broadcast %cst : f32 to vector<16x128xf32>
    %c0 = arith.constant 0 : index
    %c0_0 = arith.constant 0 : index
    %1 = vector.load %arg10[%c0, %c0_0] : memref<16x128xf32, #tpu.memory_space<vmem>>, vector<16x128xf32>
    tpu.vector_store %arg10[%c0, %c0_0], %0 {strides = array<i32>} : memref<16x128xf32, #tpu.memory_space<vmem>>, vector<16x128xf32>,
    %c0_1 = arith.constant 0 : index
    %c0_2 = arith.constant 0 : index
    %2 = vector.load %arg1[%c0_1, %c0_2] : memref<16x8xf32, #tpu.memory_space<vmem>>, vector<16x8xf32>
    %c0_3 = arith.constant 0 : index
    %c0_4 = arith.constant 0 : index
    %3 = vector.load %arg10[%c0_3, %c0_4] : memref<16x128xf32, #tpu.memory_space<vmem>>, vector<16x8xf32>
    tpu.vector_store %arg10[%c0_3, %c0_4], %2 {strides = array<i32>} : memref<16x128xf32, #tpu.memory_space<vmem>>, vector<16x8xf32>,
    %c0_5 = arith.constant 0 : index
    %c0_6 = arith.constant 0 : index
    %4 = vector.load %arg2[%c0_5, %c0_6] : memref<16x2xf32, #tpu.memory_space<vmem>>, vector<16x2xf32>
    %c0_7 = arith.constant 0 : index
    %c8 = arith.constant 8 : index
    %5 = vector.load %arg10[%c0_7, %c8] : memref<16x128xf32, #tpu.memory_space<vmem>>, vector<16x2xf32>
    tpu.vector_store %arg10[%c0_7, %c8], %4 {strides = array<i32>} : memref<16x128xf32, #tpu.memory_space<vmem>>, vector<16x2xf32>,
    %c0_8 = arith.constant 0 : index
    %c0_9 = arith.constant 0 : index
    %6 = vector.load %arg10[%c0_8, %c0_9] : memref<16x128xf32, #tpu.memory_space<vmem>>, vector<16x128xf32>
    %c0_10 = arith.constant 0 : index
    %c0_11 = arith.constant 0 : index
    %7 = vector.load %arg3[%c0_10, %c0_11] : memref<128x384xf32, #tpu.memory_space<vmem>>, vector<128x384xf32>
    %cst_12 = arith.constant dense<0.000000e+00> : vector<16x384xf32>
    %8 = tpu.matmul %6, %7, %cst_12 {dimension_numbers = #tpu.dot_dimension_numbers<[1], [0], [0], [1], [0, 0, 1, 1], [], []>} : vector<16x128xf32>, vector<128x384xf32>, vector<16x384xf32> -> vector<16x384xf32>
    %c0_13 = arith.constant 0 : index
    %c0_14 = arith.constant 0 : index
    %9 = vector.load %arg4[%c0_13, %c0_14] : memref<1x384xf32, #tpu.memory_space<vmem>>, vector<1x384xf32>
    %10 = vector.broadcast %9 : vector<1x384xf32> to vector<16x384xf32>
    %11 = arith.addf %8, %10 : vector<16x384xf32>
    %cst_15 = arith.constant 0.000000e+00 : f32
    %12 = vector.broadcast %cst_15 : f32 to vector<16x384xf32>
    %13 = arith.maximumf %11, %12 : vector<16x384xf32>
    %c0_16 = arith.constant 0 : index
    %c0_17 = arith.constant 0 : index
    %14 = vector.load %arg5[%c0_16, %c0_17] : memref<384x512xf32, #tpu.memory_space<vmem>>, vector<384x512xf32>
    %cst_18 = arith.constant dense<0.000000e+00> : vector<16x512xf32>
    %15 = tpu.matmul %13, %14, %cst_18 {dimension_numbers = #tpu.dot_dimension_numbers<[1], [0], [0], [1], [0, 0, 1, 1], [], []>} : vector<16x384xf32>, vector<384x512xf32>, vector<16x512xf32> -> vector<16x512xf32>
    %c0_19 = arith.constant 0 : index
    %c0_20 = arith.constant 0 : index
    %16 = vector.load %arg6[%c0_19, %c0_20] : memref<1x512xf32, #tpu.memory_space<vmem>>, vector<1x512xf32>
    %17 = vector.broadcast %16 : vector<1x512xf32> to vector<16x512xf32>
    %18 = arith.addf %15, %17 : vector<16x512xf32>
    %cst_21 = arith.constant 0.000000e+00 : f32
    %19 = vector.broadcast %cst_21 : f32 to vector<16x512xf32>
    %20 = arith.maximumf %18, %19 : vector<16x512xf32>
    %c0_22 = arith.constant 0 : index
    %c0_23 = arith.constant 0 : index
    %21 = vector.load %arg7[%c0_22, %c0_23] : memref<1x512xf32, #tpu.memory_space<vmem>>, vector<1x512xf32>
    %22 = vector.broadcast %21 : vector<1x512xf32> to vector<16x512xf32>
    %23 = arith.mulf %20, %22 : vector<16x512xf32>
    %cst_24 = arith.constant dense<0.000000e+00> : vector<16xf32>
    %24 = vector.multi_reduction <add>, %23, %cst_24 [1] : vector<16x512xf32> to vector<16xf32>
    %25 = vector.shape_cast %24 : vector<16xf32> to vector<16x1xf32>
    %c0_25 = arith.constant 0 : index
    %c0_26 = arith.constant 0 : index
    %26 = vector.load %arg8[%c0_25, %c0_26] : memref<1x1xf32, #tpu.memory_space<vmem>>, vector<1x1xf32>
    %27 = vector.broadcast %26 : vector<1x1xf32> to vector<16x1xf32>
    %28 = arith.addf %25, %27 : vector<16x1xf32>
    %c0_27 = arith.constant 0 : index
    %c0_28 = arith.constant 0 : index
    %29 = vector.load %arg9[%c0_27, %c0_28] : memref<16x1xf32, #tpu.memory_space<vmem>>, vector<16x1xf32>
    tpu.vector_store %arg9[%c0_27, %c0_28], %28 {strides = array<i32>} : memref<16x1xf32, #tpu.memory_space<vmem>>, vector<16x1xf32>,
    return
  }
  func.func @transform_0(%arg0: i32) -> (i32, i32) {
    %c0_i32 = arith.constant 0 : i32
    %c0_i32_0 = arith.constant 0 : i32
    return %arg0, %c0_i32 : i32, i32
  }
  func.func @transform_1(%arg0: i32) -> (i32, i32) {
    %c0_i32 = arith.constant 0 : i32
    %c0_i32_0 = arith.constant 0 : i32
    return %arg0, %c0_i32 : i32, i32
  }
  func.func @transform_2(%arg0: i32) -> (i32, i32) {
    %c0_i32 = arith.constant 0 : i32
    %c0_i32_0 = arith.constant 0 : i32
    %c0_i32_1 = arith.constant 0 : i32
    return %c0_i32, %c0_i32_0 : i32, i32
  }
  func.func @transform_3(%arg0: i32) -> (i32, i32) {
    %c0_i32 = arith.constant 0 : i32
    %c0_i32_0 = arith.constant 0 : i32
    %c0_i32_1 = arith.constant 0 : i32
    return %c0_i32, %c0_i32_0 : i32, i32
  }
  func.func @transform_4(%arg0: i32) -> (i32, i32) {
    %c0_i32 = arith.constant 0 : i32
    %c0_i32_0 = arith.constant 0 : i32
    %c0_i32_1 = arith.constant 0 : i32
    return %c0_i32, %c0_i32_0 : i32, i32
  }
  func.func @transform_5(%arg0: i32) -> (i32, i32) {
    %c0_i32 = arith.constant 0 : i32
    %c0_i32_0 = arith.constant 0 : i32
    %c0_i32_1 = arith.constant 0 : i32
    return %c0_i32, %c0_i32_0 : i32, i32
  }
  func.func @transform_6(%arg0: i32) -> (i32, i32) {
    %c0_i32 = arith.constant 0 : i32
    %c0_i32_0 = arith.constant 0 : i32
    %c0_i32_1 = arith.constant 0 : i32
    return %c0_i32, %c0_i32_0 : i32, i32
  }
  func.func @transform_7(%arg0: i32) -> (i32, i32) {
    %c0_i32 = arith.constant 0 : i32
    %c0_i32_0 = arith.constant 0 : i32
    %c0_i32_1 = arith.constant 0 : i32
    return %c0_i32, %c0_i32_0 : i32, i32
  }
  func.func @transform_8(%arg0: i32) -> (i32, i32) {
    %c0_i32 = arith.constant 0 : i32
    %c0_i32_0 = arith.constant 0 : i32
    return %arg0, %c0_i32 : i32, i32
  }
}

</mosaic_0001>

<bundles_post_ra>
// kernel: tpu_custom_call.1
= control target key start
LH: loop header
LB: loop body
LE: loop exit
PB: predicated region body
PF: predicated region fallthrough
CT: control target
= control target key end

     0   :  { %s1554_s0 = inlined_call_operand.hbm [shape: f32[2,8], index: 0, kind: input, shape index: {}]   ;;  %s1555_s1 = inlined_call_operand.hbm [shape: f32[2,2], index: 1, kind: input, shape index: {}]   ;;  %s1556_s2 = inlined_call_operand.hbm [shape: f32[128,384], index: 2, kind: input, shape index: {}]   ;;  %s1557_s3 = inlined_call_operand.vmem [shape: f32[1,384], index: 3, kind: input, shape index: {}]   ;;  %s1558_s4 = inlined_call_operand.hbm [shape: f32[384,512], index: 4, kind: input, shape index: {}]   ;;  %s1559_s5 = inlined_call_operand.vmem [shape: f32[1,512], index: 5, kind: input, shape index: {}]   ;;  %s1560_s6 = inlined_call_operand.vmem [shape: f32[1,512], index: 6, kind: input, shape index: {}]   ;;  %s1561_s7 = inlined_call_operand.<no memory space> [shape: f32[1,1], index: 7, kind: input, shape index: {}]   ;;  %s1562_s8 = inlined_call_operand.vmem [shape: f32[2,1], index: 8, kind: output, shape index: {}]  }
   0x1   :  { %v13_v0 = vstv %s1561_s7 }
   0x2   :  { %14 = vst [vmem:[#allocation3] sm:$0x1] %v13_v0 }
   0x3   :  { %15 = vsyncpa [#allocation5], 0 }
   0x4   :  { %16 = vsyncpa [#allocation7], 0 }
   0x5   :  { %17 = vsyncpa [#allocation10], 0 }
   0x6   :  { %22 = vsyncadd [#allocation5], 224  ;;  %s1386_s29 = smov [#allocation4]   ;;  %s1292_s11 = scalar_lea.hbm %s1554_s0, 32 }
   0x7   :  { %s23_s30 = sshll.u32 %s1386_s29, 4  ;;  %p1293_p0 = scmp.ne.s32.totalorder %s1554_s0, %s1292_s11  ;;  %s24_s30 = int_to_ptr.vmem [resolvable:$true] %s23_s30 }
   0x8   :  { %p1296_p1 = scmp.lt.u32.totalorder %s1292_s11, %s1554_s0 }
   0xa   :  { %p1298_p2 = pnand %p1296_p1, %p1293_p0 }
   0xc   :  { %1301 = shalt.err (!%p1298_p2)
}
   0xd   :  { %s1302_s7 = scalar_lea.vmem %s24_s30, 32  ;;  %s1306_s16 = scalar_lea.vmem %s24_s30, 256 }
   0xe   :  { %p1303_p3 = scmp.ne.s32.totalorder %s24_s30, %s1302_s7  ;;  %p1307_p4 = scmp.lt.s32.totalorder %s24_s30, %s24_s30 }
   0xf   :  { %p1308_p5 = scmp.lt.s32.totalorder %s1306_s16, %s1302_s7 }
  0x11   :  { %p1309_p6 = por %p1308_p5, %p1307_p4 }
  0x13   :  { %p1310_p7 = pnand %p1309_p6, %p1303_p3 }
  0x15   :  { %1313 = shalt.err (!%p1310_p7)
}
  0x16   :  { %s1387_s17 = smov 32   ;;  %s1388_s18 = smov 2  }
  0x17   :  { %29 = dma.hbm_to_vmem [thread:$0]  %s1554_s0, 32, %s24_s30, [#allocation5], %s1387_s17, %s1387_s17, %s1388_s18  }
  0x18   :  { %34 = vsyncadd [#allocation7], 224  ;;  %s1389_s21 = smov [#allocation6]   ;;  %s1390_s23 = smov [#allocation8]  }
  0x19   :  { %s35_s22 = sshll.u32 %s1389_s21, 4  ;;  %s47_s24 = sshll.u32 %s1390_s23, 4  ;;  %s36_s22 = int_to_ptr.vmem [resolvable:$true] %s35_s22  ;;  %s1459_s24 = int_to_ptr.vmem [resolvable:$true] %s47_s24 }
  0x1a   :  { %s1314_s27 = scalar_lea.hbm %s1555_s1, 32 }
  0x1b   :  { %p1315_p8 = scmp.ne.s32.totalorder %s1555_s1, %s1314_s27  ;;  %p1318_p9 = scmp.lt.u32.totalorder %s1314_s27, %s1555_s1 }
  0x1d   :  { %p1320_p10 = pnand %p1318_p9, %p1315_p8 }
  0x1f   :  { %1323 = shalt.err (!%p1320_p10)
}
  0x20   :  { %s1324_s0 = scalar_lea.vmem %s36_s22, 32  ;;  %s1328_s30 = scalar_lea.vmem %s36_s22, 256 }
  0x21   :  { %p1325_p11 = scmp.ne.s32.totalorder %s36_s22, %s1324_s0  ;;  %p1329_p12 = scmp.lt.s32.totalorder %s36_s22, %s36_s22 }
  0x22   :  { %p1330_p13 = scmp.lt.s32.totalorder %s1328_s30, %s1324_s0 }
  0x24   :  { %p1331_p0 = por %p1330_p13, %p1329_p12 }
  0x26   :  { %p1332_p1 = pnand %p1331_p0, %p1325_p11 }
  0x28   :  { %1335 = shalt.err (!%p1332_p1)
}
  0x29   :  { %41 = dma.hbm_to_vmem [thread:$0]  %s1555_s1, 32, %s36_s22, [#allocation7], %s1387_s17, %s1387_s17, %s1388_s18  }
  0x2a   :  { %s1336_s15 = scalar_lea.hbm %s1556_s2, 6144 }
  0x2b   :  { %p1337_p2 = scmp.ne.s32.totalorder %s1556_s2, %s1336_s15  ;;  %p1340_p3 = scmp.lt.u32.totalorder %s1336_s15, %s1556_s2 }
  0x2d   :  { %p1342_p4 = pnand %p1340_p3, %p1337_p2 }
  0x2f   :  { %1345 = shalt.err (!%p1342_p4)
}
  0x30   :  { %s1346_s21 = scalar_lea.vmem %s1459_s24, 6144  ;;  %p1351_p6 = scmp.lt.s32.totalorder %s1459_s24, %s1459_s24 }
  0x31   :  { %p1347_p5 = scmp.ne.s32.totalorder %s1459_s24, %s1346_s21  ;;  %p1352_p7 = scmp.lt.s32.totalorder %s1346_s21, %s1346_s21 }
  0x33   :  { %p1353_p8 = por %p1352_p7, %p1351_p6 }
  0x35   :  { %p1354_p9 = pnand %p1353_p8, %p1347_p5 }
  0x37   :  { %1357 = shalt.err (!%p1354_p9)
}
  0x38   :  { %s1391_s1 = smov 384   ;;  %s1392_s18 = smov 24  }
  0x39   :  { %53 = dma.hbm_to_vmem [thread:$0]  %s1556_s2, 6144, %s1459_s24, [#allocation7], %s1391_s1, %s1391_s1, %s1392_s18  }
  0x3a   :  { %s1393_s25 = smov [#allocation9]   ;;  %s1358_s29 = scalar_lea.hbm %s1558_s4, 24576 }
  0x3b   :  { %s61_s26 = sshll.u32 %s1393_s25, 4  ;;  %p1359_p10 = scmp.ne.s32.totalorder %s1558_s4, %s1358_s29  ;;  %s62_s26 = int_to_ptr.vmem [resolvable:$true] %s61_s26 }
  0x3c   :  { %p1362_p11 = scmp.lt.u32.totalorder %s1358_s29, %s1558_s4 }
  0x3e   :  { %p1364_p12 = pnand %p1362_p11, %p1359_p10 }
  0x40   :  { %1367 = shalt.err (!%p1364_p12)
}
  0x41   :  { %s1368_s11 = scalar_lea.vmem %s62_s26, 24576  ;;  %p1373_p0 = scmp.lt.s32.totalorder %s62_s26, %s62_s26 }
  0x42   :  { %p1369_p13 = scmp.ne.s32.totalorder %s62_s26, %s1368_s11  ;;  %p1374_p1 = scmp.lt.s32.totalorder %s1368_s11, %s1368_s11 }
  0x44   :  { %p1375_p2 = por %p1374_p1, %p1373_p0 }
  0x46   :  { %p1376_p3 = pnand %p1375_p2, %p1369_p13 }
  0x48   :  { %1379 = shalt.err (!%p1376_p3)
}
  0x49   :  { %s1394_s2 = smov 512  }
  0x4a   :  { %67 = dma.hbm_to_vmem [thread:$0]  %s1558_s4, 24576, %s62_s26, [#allocation10], %s1394_s2, %s1394_s2, %s1387_s17  }
  0x4b   :  { %1380 = dma.done.wait [#allocation5], 256  }
  0x4c   :  { %1381 = vsyncadd [#allocation5], 4294967040 }
  0x4d   :  { %1382 = dma.done.wait [#allocation7], 6400  }
  0x4e   :  { %1383 = vsyncadd [#allocation7], 4294960896 }
  0x4f   :  { %1384 = dma.done.wait [#allocation10], 24576  }
  0x50   :  { %1385 = vsyncadd [#allocation10], 4294942720  ;;  %v1395_v1 = vmov 0.0   ;;  %v93_v2 = vld [vmem:[#allocation6] sm:$0xff]  ;;  %v94_v3 = vld [vmem:[#allocation6 + $0x8] sm:$0xff]  ;;  %s1396_s13 = smov 8  }
  0x51   :  { %86 = vst [vmem:[#allocation2] sm:$0xff] %v1395_v1  ;;  %87 = vst [vmem:[#allocation2 + $0x8] sm:$0xff] %v1395_v1  ;;  %237 = vmatprep.mubr.f32.mxu0 %v1395_v1  ;;  %v109_v4 = vld [vmem:[#allocation8 + $0x8] sm:$0xff]  ;;  %97 = vrot.lane.b32.xlu0 %v93_v2, %s1396_s13  ;;  %v112_v5 = vld [vmem:[#allocation8 + $0x20] sm:$0xff]  ;;  %vm90_vm0 = vcmask 64512   ;;  %vm103_vm1 = vcmask 80960  }
  0x52   :  { %v108_v6 = vld [vmem:[#allocation8] sm:$0xff]  ;;  %v111_v7 = vld [vmem:[#allocation8 + $0x18] sm:$0xff]  ;;  %v1009_v8 = vpack.c.bf16 %v112_v5, %v109_v4  ;;  %v118_v11 = vld [vmem:[#allocation8 + $0x50] sm:$0xff]  ;;  %vm910_vm2 = vcmask 7168  }
  0x53   :  { %v1011_v9 = vpack.c.bf16 %v111_v7, %v108_v6  ;;  %v115_v10 = vld [vmem:[#allocation8 + $0x38] sm:$0xff]  ;;  %v114_v12 = vld [vmem:[#allocation8 + $0x30] sm:$0xff]  ;;  %v117_v14 = vld [vmem:[#allocation8 + $0x48] sm:$0xff] }
  0x54   :  { %v1013_v13 = vpack.c.bf16 %v118_v11, %v115_v10  ;;  %v121_v15 = vld [vmem:[#allocation8 + $0x68] sm:$0xff]  ;;  %v124_v16 = vld [vmem:[#allocation8 + $0x80] sm:$0xff]  ;;  %1010 = vmatprep.subr.bf16.mxu0 %v1009_v8  ;;  %v1015_v17 = vpack.c.bf16 %v117_v14, %v114_v12  ;;  %v123_v20 = vld [vmem:[#allocation8 + $0x78] sm:$0xff] }
  0x55   :  { %99 = vrot.lane.b32.xlu0 %v94_v3, %s1396_s13  ;;  %1012 = vmatpush1.bf16.msra.mxu0 %v1011_v9  ;;  %v1017_v18 = vpack.c.bf16 %v124_v16, %v121_v15  ;;  %v120_v19 = vld [vmem:[#allocation8 + $0x60] sm:$0xff]  ;;  %v127_v21 = vld [vmem:[#allocation8 + $0x98] sm:$0xff]  ;;  %v130_v22 = vld [vmem:[#allocation8 + $0xb0] sm:$0xff] }
  0x56   :  { %1014 = vmatprep.subr.bf16.mxu0 %v1013_v13  ;;  %v88_v23 = vld [vmem:[#allocation4] sm:$0xff]  ;;  %v1019_v24 = vpack.c.bf16 %v123_v20, %v120_v19  ;;  %v126_v25 = vld [vmem:[#allocation8 + $0x90] sm:$0xff]  ;;  %v1021_v26 = vpack.c.bf16 %v130_v22, %v127_v21  ;;  %v129_v27 = vld [vmem:[#allocation8 + $0xa8] sm:$0xff] }
  0x57   :  { %91 = vst.msk [vmem:[#allocation2] sm:$0xff] %vm90_vm0, %v88_v23  ;;  %v110_v28 = vld [vmem:[#allocation8 + $0x10] sm:$0xff]  ;;  %v113_v29 = vld [vmem:[#allocation8 + $0x28] sm:$0xff]  ;;  %v136_v31 = vld [vmem:[#allocation8 + $0xe0] sm:$0xff]  ;;  %v1023_v35 = vpack.c.bf16 %v129_v27, %v126_v25 }
  0x58   :  { %v133_v30 = vld [vmem:[#allocation8 + $0xc8] sm:$0xff]  ;;  %v1041_v32 = vpack.c.bf16 %v113_v29, %v110_v28  ;;  %v116_v33 = vld [vmem:[#allocation8 + $0x40] sm:$0xff]  ;;  %v119_v34 = vld [vmem:[#allocation8 + $0x58] sm:$0xff] }
  0x59   :  { %1016 = vmatpush1.bf16.msra.mxu0 %v1015_v17  ;;  %v1045_v36 = vpack.c.bf16 %v119_v34, %v116_v33  ;;  %v122_v37 = vld [vmem:[#allocation8 + $0x70] sm:$0xff]  ;;  %v125_v38 = vld [vmem:[#allocation8 + $0x88] sm:$0xff]  ;;  %v1025_v39 = vpack.c.bf16 %v136_v31, %v133_v30  ;;  %v132_v40 = vld [vmem:[#allocation8 + $0xc0] sm:$0xff] }
  0x5a   :  { %1018 = vmatprep.subr.bf16.mxu0 %v1017_v18  ;;  %1042 = vmatprep.subr.bf16.mxu1 %v1041_v32  ;;  %v135_v41 = vld [vmem:[#allocation8 + $0xd8] sm:$0xff]  ;;  %v142_v43 = vld [vmem:[#allocation8 + $0x110] sm:$0xff]  ;;  %v1049_v44 = vpack.c.bf16 %v125_v38, %v122_v37  ;;  %v89_v45 = vld [vmem:[#allocation4 + $0x8] sm:$0xff] }
  0x5b   :  { %1044 = vmatpush3.bf16.msra.mxu1 %v1041_v32  ;;  %v139_v42 = vld [vmem:[#allocation8 + $0xf8] sm:$0xff]  ;;  %v128_v46 = vld [vmem:[#allocation8 + $0xa0] sm:$0xff]  ;;  %92 = vst.msk [vmem:[#allocation2 + $0x8] sm:$0xff] %vm90_vm0, %v89_v45  ;;  %v1027_v48 = vpack.c.bf16 %v135_v41, %v132_v40  ;;  %v138_v50 = vld [vmem:[#allocation8 + $0xf0] sm:$0xff] }
  0x5c   :  { %1046 = vmatprep.subr.bf16.mxu1 %v1045_v36  ;;  %v131_v47 = vld [vmem:[#allocation8 + $0xb8] sm:$0xff]  ;;  %v1029_v49 = vpack.c.bf16 %v142_v43, %v139_v42  ;;  %v141_v51 = vld [vmem:[#allocation8 + $0x108] sm:$0xff]  ;;  %v148_v53 = vld [vmem:[#allocation8 + $0x140] sm:$0xff] }
  0x5d   :  { %1020 = vmatpush1.bf16.msra.mxu0 %v1019_v24  ;;  %v145_v52 = vld [vmem:[#allocation8 + $0x128] sm:$0xff]  ;;  %v1053_v54 = vpack.c.bf16 %v131_v47, %v128_v46  ;;  %v134_v55 = vld [vmem:[#allocation8 + $0xd0] sm:$0xff]  ;;  %v1031_v57 = vpack.c.bf16 %v141_v51, %v138_v50  ;;  %v144_v59 = vld [vmem:[#allocation8 + $0x120] sm:$0xff] }
  0x5e   :  { %1022 = vmatprep.subr.bf16.mxu0 %v1021_v26  ;;  %v137_v56 = vld [vmem:[#allocation8 + $0xe8] sm:$0xff]  ;;  %v1033_v58 = vpack.c.bf16 %v148_v53, %v145_v52  ;;  %v147_v60 = vld [vmem:[#allocation8 + $0x138] sm:$0xff]  ;;  %v154_v62 = vld [vmem:[#allocation8 + $0x170] sm:$0xff] }
  0x5f   :  { %1048 = vmatpush3.bf16.msra.mxu1 %v1045_v36  ;;  %v151_v61 = vld [vmem:[#allocation8 + $0x158] sm:$0xff]  ;;  %v1057_v63 = vpack.c.bf16 %v137_v56, %v134_v55  ;;  %v140_v0 = vld [vmem:[#allocation8 + $0x100] sm:$0xff]  ;;  %v1035_v3 = vpack.c.bf16 %v147_v60, %v144_v59  ;;  %v150_v5 = vld [vmem:[#allocation8 + $0x150] sm:$0xff] }
  0x60   :  { %1050 = vmatprep.subr.bf16.mxu1 %v1049_v44  ;;  %v143_v2 = vld [vmem:[#allocation8 + $0x118] sm:$0xff]  ;;  %v1037_v4 = vpack.c.bf16 %v154_v62, %v151_v61  ;;  %v153_v6 = vld [vmem:[#allocation8 + $0x168] sm:$0xff]  ;;  %v146_v10 = vld [vmem:[#allocation8 + $0x130] sm:$0xff] }
  0x61   :  { %1024 = vmatpush1.bf16.msra.mxu0 %v1023_v35  ;;  %v1061_v7 = vpack.c.bf16 %v143_v2, %v140_v0  ;;  %v332_v8 = vld [vmem:[#allocation9 + $0x8] sm:$0xff]  ;;  %v1039_v12 = vpack.c.bf16 %v153_v6, %v150_v5  ;;  %v152_v15 = vld [vmem:[#allocation8 + $0x160] sm:$0xff]  ;;  %v155_v16 = vld [vmem:[#allocation8 + $0x178] sm:$0xff] }
  0x62   :  { %1026 = vmatprep.subr.bf16.mxu0 %v1025_v39  ;;  %v336_v9 = vld [vmem:[#allocation9 + $0x28] sm:$0xff]  ;;  %v1069_v17 = vpack.c.bf16 %v155_v16, %v152_v15  ;;  %v334_v18 = vld [vmem:[#allocation9 + $0x18] sm:$0xff]  ;;  %v331_v22 = vld [vmem:[#allocation9] sm:$0xff] }
  0x63   :  { %1052 = vmatpush3.bf16.msra.mxu1 %v1049_v44  ;;  %v149_v11 = vld [vmem:[#allocation8 + $0x148] sm:$0xff]  ;;  %v1073_v13 = vpack.c.bf16 %v336_v9, %v332_v8  ;;  %v338_v19 = vld [vmem:[#allocation9 + $0x38] sm:$0xff]  ;;  %v335_v23 = vld [vmem:[#allocation9 + $0x20] sm:$0xff] }
  0x64   :  { %1054 = vmatprep.subr.bf16.mxu1 %v1053_v54  ;;  %v1065_v14 = vpack.c.bf16 %v149_v11, %v146_v10  ;;  %v1169_v20 = vpack.c.bf16 %v338_v19, %v334_v18  ;;  %v340_v25 = vld [vmem:[#allocation9 + $0x48] sm:$0xff]  ;;  %v1075_v27 = vpack.c.bf16 %v335_v23, %v331_v22  ;;  %v333_v28 = vld [vmem:[#allocation9 + $0x10] sm:$0xff]  ;;  %v342_v30 = vld [vmem:[#allocation9 + $0x58] sm:$0xff] }
  0x65   :  { %1028 = vmatpush1.bf16.msra.mxu0 %v1027_v48  ;;  %v344_v26 = vld [vmem:[#allocation9 + $0x68] sm:$0xff]  ;;  %v337_v29 = vld [vmem:[#allocation9 + $0x30] sm:$0xff]  ;;  %v346_v32 = vld [vmem:[#allocation9 + $0x78] sm:$0xff] }
  0x66   :  { %1030 = vmatprep.subr.bf16.mxu0 %v1029_v49  ;;  %v1077_v31 = vpack.c.bf16 %v344_v26, %v340_v25  ;;  %v339_v33 = vld [vmem:[#allocation9 + $0x40] sm:$0xff]  ;;  %v348_v36 = vld [vmem:[#allocation9 + $0x88] sm:$0xff]  ;;  %v1171_v38 = vpack.c.bf16 %v337_v29, %v333_v28  ;;  %v341_v40 = vld [vmem:[#allocation9 + $0x50] sm:$0xff]  ;;  %v1173_v43 = vpack.c.bf16 %v346_v32, %v342_v30 }
  0x67   :  { %1056 = vmatpush3.bf16.msra.mxu1 %v1053_v54  ;;  %v343_v34 = vld [vmem:[#allocation9 + $0x60] sm:$0xff]  ;;  %v352_v37 = vld [vmem:[#allocation9 + $0xa8] sm:$0xff]  ;;  %v345_v41 = vld [vmem:[#allocation9 + $0x70] sm:$0xff] }
  0x68   :  { %1058 = vmatprep.subr.bf16.mxu1 %v1057_v63  ;;  %v1079_v39 = vpack.c.bf16 %v343_v34, %v339_v33  ;;  %v350_v42 = vld [vmem:[#allocation9 + $0x98] sm:$0xff]  ;;  %v1081_v44 = vpack.c.bf16 %v352_v37, %v348_v36  ;;  %v347_v46 = vld [vmem:[#allocation9 + $0x80] sm:$0xff]  ;;  %v356_v49 = vld [vmem:[#allocation9 + $0xc8] sm:$0xff]  ;;  %v1175_v51 = vpack.c.bf16 %v345_v41, %v341_v40 }
  0x69   :  { %1032 = vmatpush1.bf16.msra.mxu0 %v1031_v57  ;;  %v354_v45 = vld [vmem:[#allocation9 + $0xb8] sm:$0xff]  ;;  %v351_v47 = vld [vmem:[#allocation9 + $0xa0] sm:$0xff]  ;;  %v360_v50 = vld [vmem:[#allocation9 + $0xe8] sm:$0xff] }
  0x6a   :  { %1034 = vmatprep.subr.bf16.mxu0 %v1033_v58  ;;  %v1083_v52 = vpack.c.bf16 %v351_v47, %v347_v46  ;;  %v349_v53 = vld [vmem:[#allocation9 + $0x90] sm:$0xff]  ;;  %v1177_v55 = vpack.c.bf16 %v354_v45, %v350_v42  ;;  %v1085_v56 = vpack.c.bf16 %v360_v50, %v356_v49  ;;  %v358_v57 = vld [vmem:[#allocation9 + $0xd8] sm:$0xff]  ;;  %v355_v58 = vld [vmem:[#allocation9 + $0xc0] sm:$0xff] }
  0x6b   :  { %1060 = vmatpush3.bf16.msra.mxu1 %v1057_v63  ;;  %v353_v54 = vld [vmem:[#allocation9 + $0xb0] sm:$0xff]  ;;  %v359_v59 = vld [vmem:[#allocation9 + $0xe0] sm:$0xff]  ;;  %v362_v60 = vld [vmem:[#allocation9 + $0xf8] sm:$0xff] }
  0x6c   :  { %1062 = vmatprep.subr.bf16.mxu1 %v1061_v7  ;;  %v364_v61 = vld [vmem:[#allocation9 + $0x108] sm:$0xff]  ;;  %v1179_v63 = vpack.c.bf16 %v353_v54, %v349_v53  ;;  %v1087_v0 = vpack.c.bf16 %v359_v59, %v355_v58  ;;  %v357_v2 = vld [vmem:[#allocation9 + $0xd0] sm:$0xff]  ;;  %v366_v6 = vld [vmem:[#allocation9 + $0x118] sm:$0xff] }
  0x6d   :  { %1036 = vmatpush1.bf16.msra.mxu0 %v1035_v3  ;;  %v368_v62 = vld [vmem:[#allocation9 + $0x128] sm:$0xff]  ;;  %v361_v3 = vld [vmem:[#allocation9 + $0xf0] sm:$0xff]  ;;  %v367_v8 = vld [vmem:[#allocation9 + $0x120] sm:$0xff] }
  0x6e   :  { %1038 = vmatprep.subr.bf16.mxu0 %v1037_v4  ;;  %v1181_v4 = vpack.c.bf16 %v362_v60, %v358_v57  ;;  %v1089_v5 = vpack.c.bf16 %v368_v62, %v364_v61  ;;  %v370_v9 = vld [vmem:[#allocation9 + $0x138] sm:$0xff]  ;;  %v372_v10 = vld [vmem:[#allocation9 + $0x148] sm:$0xff]  ;;  %v369_v15 = vld [vmem:[#allocation9 + $0x130] sm:$0xff] }
  0x6f   :  { %1064 = vmatpush3.bf16.msra.mxu1 %v1061_v7  ;;  %v363_v7 = vld [vmem:[#allocation9 + $0x100] sm:$0xff]  ;;  %v376_v11 = vld [vmem:[#allocation9 + $0x168] sm:$0xff]  ;;  %v1185_v16 = vpack.c.bf16 %v370_v9, %v366_v6  ;;  %v374_v18 = vld [vmem:[#allocation9 + $0x158] sm:$0xff] }
  0x70   :  { %1066 = vmatprep.subr.bf16.mxu1 %v1065_v14  ;;  %v371_v19 = vld [vmem:[#allocation9 + $0x140] sm:$0xff]  ;;  %v380_v22 = vld [vmem:[#allocation9 + $0x188] sm:$0xff]  ;;  %v373_v26 = vld [vmem:[#allocation9 + $0x150] sm:$0xff] }
  0x71   :  { %1040 = vmatpush1.bf16.msra.mxu0 %v1039_v12  ;;  %v1183_v12 = vpack.c.bf16 %v361_v3, %v357_v2  ;;  %v384_v23 = vld [vmem:[#allocation9 + $0x1a8] sm:$0xff]  ;;  %v382_v30 = vld [vmem:[#allocation9 + $0x198] sm:$0xff]  ;;  %v383_v32 = vld [vmem:[#allocation9 + $0x1a0] sm:$0xff] }
  0x72   :  { %1074 = vmatprep.subr.bf16.mxu0 %v1073_v13  ;;  %v1091_v13 = vpack.c.bf16 %v367_v8, %v363_v7  ;;  %v1097_v29 = vpack.c.bf16 %v384_v23, %v380_v22  ;;  %v386_v33 = vld [vmem:[#allocation9 + $0x1b8] sm:$0xff]  ;;  %v388_v34 = vld [vmem:[#allocation9 + $0x1c8] sm:$0xff]  ;;  %v389_v50 = vld [vmem:[#allocation9 + $0x1d0] sm:$0xff] }
  0x73   :  { %1068 = vmatpush3.bf16.msra.mxu1 %v1065_v14  ;;  %v365_v14 = vld [vmem:[#allocation9 + $0x110] sm:$0xff]  ;;  %v1193_v40 = vpack.c.bf16 %v386_v33, %v382_v30  ;;  %v390_v42 = vld [vmem:[#allocation9 + $0x1d8] sm:$0xff]  ;;  %v396_v46 = vld [vmem:[#allocation9 + $0x208] sm:$0xff] }
  0x74   :  { %1070 = vmatprep.subr.bf16.mxu1 %v1069_v17  ;;  %v394_v45 = vld [vmem:[#allocation9 + $0x1f8] sm:$0xff]  ;;  %v400_v47 = vld [vmem:[#allocation9 + $0x228] sm:$0xff]  ;;  %v397_v62 = vld [vmem:[#allocation9 + $0x210] sm:$0xff] }
  0x75   :  { %v1105_v53 = vpack.c.bf16 %v400_v47, %v396_v46  ;;  %v398_v54 = vld [vmem:[#allocation9 + $0x218] sm:$0xff]  ;;  %v404_v58 = vld [vmem:[#allocation9 + $0x248] sm:$0xff]  ;;  %v413_v23 = vld [vmem:[#allocation9 + $0x290] sm:$0xff] }
  0x76   :  { %v402_v57 = vld [vmem:[#allocation9 + $0x238] sm:$0xff]  ;;  %v408_v59 = vld [vmem:[#allocation9 + $0x268] sm:$0xff]  ;;  %v429_v47 = vld [vmem:[#allocation9 + $0x310] sm:$0xff] }
  0x77   :  { %1072 = vmatpush3.bf16.msra.mxu1 %v1069_v17  ;;  %v1093_v17 = vpack.c.bf16 %v376_v11, %v372_v10  ;;  %v1109_v2 = vpack.c.bf16 %v408_v59, %v404_v58  ;;  %v406_v3 = vld [vmem:[#allocation9 + $0x258] sm:$0xff]  ;;  %v412_v7 = vld [vmem:[#allocation9 + $0x288] sm:$0xff]  ;;  %v405_v11 = vld [vmem:[#allocation9 + $0x250] sm:$0xff] }
  0x78   :  { %1170 = vmatprep.subr.bf16.mxu1 %v1169_v20  ;;  %v375_v20 = vld [vmem:[#allocation9 + $0x160] sm:$0xff]  ;;  %v410_v6 = vld [vmem:[#allocation9 + $0x278] sm:$0xff]  ;;  %v416_v8 = vld [vmem:[#allocation9 + $0x2a8] sm:$0xff] }
  0x79   :  { %v1095_v25 = vpack.c.bf16 %v375_v20, %v371_v19  ;;  %v420_v19 = vld [vmem:[#allocation9 + $0x2c8] sm:$0xff]  ;;  %v426_v30 = vld [vmem:[#allocation9 + $0x2f8] sm:$0xff]  ;;  %v437_v59 = vld [vmem:[#allocation9 + $0x350] sm:$0xff] }
  0x7a   :  { %v424_v20 = vld [vmem:[#allocation9 + $0x2e8] sm:$0xff] }
  0xc3   :  { %v98_v21 = vpop.permute.xlu0 %97 }
  0xc4   :  { %104 = vst.msk [vmem:[#allocation2] sm:$0xff] %vm103_vm1, %v98_v21  ;;  %v378_v21 = vld [vmem:[#allocation9 + $0x178] sm:$0xff] }
  0xc5   :  { %v1189_v28 = vpack.c.bf16 %v378_v21, %v374_v18  ;;  %v418_v18 = vld [vmem:[#allocation9 + $0x2b8] sm:$0xff] }
  0xc7   :  { %v100_v24 = vpop.permute.xlu0 %99 }
  0xc8   :  { %105 = vst.msk [vmem:[#allocation2 + $0x8] sm:$0xff] %vm103_vm1, %v100_v24  ;;  %v1187_v24 = vpack.c.bf16 %v369_v15, %v365_v14  ;;  %v1113_v14 = vpack.c.bf16 %v416_v8, %v412_v7  ;;  %v414_v15 = vld [vmem:[#allocation9 + $0x298] sm:$0xff]  ;;  %v445_v7 = vld [vmem:[#allocation9 + $0x390] sm:$0xff] }
  0xc9   :  { %v449_v8 = vld [vmem:[#allocation9 + $0x3b0] sm:$0xff] }
  0xcb   :  { %v106_v35 = vld [vmem:[#allocation2] sm:$0xff] }
  0xcc   :  { %238 = vmatmul.mubr.f32.vlgmr.msra.gmra.mrb[0].mxu0 %v106_v35  ;;  %1006 = vmatprep.mubr.f32.mxu1 %v106_v35  ;;  %v392_v35 = vld [vmem:[#allocation9 + $0x1e8] sm:$0xff] }
  0xcd   :  { %243 = vmatprep.mubr.f32.mxu0 %v1395_v1  ;;  %1076 = vmatpush1.bf16.msra.mxu0 %v1075_v27  ;;  %v377_v27 = vld [vmem:[#allocation9 + $0x170] sm:$0xff]  ;;  %v1101_v41 = vpack.c.bf16 %v392_v35, %v388_v34 }
  0xce   :  { %1078 = vmatprep.subr.bf16.mxu0 %v1077_v31  ;;  %v379_v31 = vld [vmem:[#allocation9 + $0x180] sm:$0xff]  ;;  %v1191_v36 = vpack.c.bf16 %v377_v27, %v373_v26  ;;  %v1117_v26 = vpack.c.bf16 %v424_v20, %v420_v19  ;;  %v422_v27 = vld [vmem:[#allocation9 + $0x2d8] sm:$0xff]  ;;  %v421_v35 = vld [vmem:[#allocation9 + $0x2d0] sm:$0xff] }
  0xcf   :  { %v107_v48 = vld [vmem:[#allocation2 + $0x8] sm:$0xff]  ;;  %v1099_v37 = vpack.c.bf16 %v383_v32, %v379_v31  ;;  %v428_v31 = vld [vmem:[#allocation9 + $0x308] sm:$0xff] }
  0xd0   :  { %244 = vmatmul.mubr.f32.gmra.mrb[2].mxu0 %v107_v48  ;;  %1007 = vmatmul.mubr.f32.vlgmr.msra.gmra.mrb[0].mxu1 %v107_v48  ;;  %v432_v32 = vld [vmem:[#allocation9 + $0x328] sm:$0xff]  ;;  %v453_v19 = vld [vmem:[#allocation9 + $0x3d0] sm:$0xff] }
  0xd1   :  { %1172 = vmatpush1.bf16.msra.mxu1 %v1171_v38  ;;  %1080 = vmatpush1.bf16.msra.mxu0 %v1079_v39  ;;  %v381_v38 = vld [vmem:[#allocation9 + $0x190] sm:$0xff] }
  0xd2   :  { %1174 = vmatprep.subr.bf16.mxu1 %v1173_v43  ;;  %1082 = vmatprep.subr.bf16.mxu0 %v1081_v44  ;;  %v385_v39 = vld [vmem:[#allocation9 + $0x1b0] sm:$0xff]  ;;  %v387_v43 = vld [vmem:[#allocation9 + $0x1c0] sm:$0xff] }
  0xd3   :  { %v391_v44 = vld [vmem:[#allocation9 + $0x1e0] sm:$0xff]  ;;  %v1195_v48 = vpack.c.bf16 %v385_v39, %v381_v38  ;;  %v1121_v38 = vpack.c.bf16 %v432_v32, %v428_v31  ;;  %v430_v39 = vld [vmem:[#allocation9 + $0x318] sm:$0xff]  ;;  %v457_v20 = vld [vmem:[#allocation9 + $0x3f0] sm:$0xff] }
  0xd4   :  { %v1103_v49 = vpack.c.bf16 %v391_v44, %v387_v43  ;;  %v436_v43 = vld [vmem:[#allocation9 + $0x348] sm:$0xff] }
  0xd5   :  { %1176 = vmatpush1.bf16.msra.mxu1 %v1175_v51  ;;  %1084 = vmatpush1.bf16.msra.mxu0 %v1083_v52  ;;  %v393_v51 = vld [vmem:[#allocation9 + $0x1f0] sm:$0xff]  ;;  %v1197_v52 = vpack.c.bf16 %v394_v45, %v390_v42  ;;  %v434_v42 = vld [vmem:[#allocation9 + $0x338] sm:$0xff]  ;;  %v440_v44 = vld [vmem:[#allocation9 + $0x368] sm:$0xff] }
  0xd6   :  { %1178 = vmatprep.subr.bf16.mxu1 %v1177_v55  ;;  %1086 = vmatprep.subr.bf16.mxu0 %v1085_v56  ;;  %v395_v55 = vld [vmem:[#allocation9 + $0x200] sm:$0xff]  ;;  %v1199_v60 = vpack.c.bf16 %v393_v51, %v389_v50  ;;  %v1125_v50 = vpack.c.bf16 %v440_v44, %v436_v43  ;;  %v438_v51 = vld [vmem:[#allocation9 + $0x358] sm:$0xff]  ;;  %v1519_v31 = vld [vmem:[%s1557_s3] sm:$0x7] }
  0xd7   :  { %v399_v56 = vld [vmem:[#allocation9 + $0x220] sm:$0xff]  ;;  %v472_v44 = vld [vmem:[#allocation9 + $0x468] sm:$0xff] }
  0xd8   :  { %v1107_v61 = vpack.c.bf16 %v399_v56, %v395_v55  ;;  %v444_v55 = vld [vmem:[#allocation9 + $0x388] sm:$0xff] }
  0xd9   :  { %1180 = vmatpush1.bf16.msra.mxu1 %v1179_v63  ;;  %1088 = vmatpush1.bf16.msra.mxu0 %v1087_v0  ;;  %v401_v63 = vld [vmem:[#allocation9 + $0x230] sm:$0xff]  ;;  %v1201_v0 = vpack.c.bf16 %v402_v57, %v398_v54  ;;  %v442_v54 = vld [vmem:[#allocation9 + $0x378] sm:$0xff]  ;;  %v448_v56 = vld [vmem:[#allocation9 + $0x3a8] sm:$0xff] }
  0xda   :  { %1182 = vmatprep.subr.bf16.mxu1 %v1181_v4  ;;  %1090 = vmatprep.subr.bf16.mxu0 %v1089_v5  ;;  %v403_v4 = vld [vmem:[#allocation9 + $0x240] sm:$0xff]  ;;  %v1203_v9 = vpack.c.bf16 %v401_v63, %v397_v62  ;;  %v1129_v62 = vpack.c.bf16 %v448_v56, %v444_v55 }
  0xdb   :  { %v407_v5 = vld [vmem:[#allocation9 + $0x260] sm:$0xff] }
  0xdc   :  { %v1111_v10 = vpack.c.bf16 %v407_v5, %v403_v4  ;;  %v443_v63 = vld [vmem:[#allocation9 + $0x380] sm:$0xff] }
  0xdd   :  { %1184 = vmatpush1.bf16.msra.mxu1 %v1183_v12  ;;  %1092 = vmatpush1.bf16.msra.mxu0 %v1091_v13  ;;  %v409_v12 = vld [vmem:[#allocation9 + $0x270] sm:$0xff]  ;;  %v1205_v13 = vpack.c.bf16 %v410_v6, %v406_v3  ;;  %v450_v3 = vld [vmem:[#allocation9 + $0x3b8] sm:$0xff] }
  0xde   :  { %1186 = vmatprep.subr.bf16.mxu1 %v1185_v16  ;;  %1094 = vmatprep.subr.bf16.mxu0 %v1093_v17  ;;  %v411_v16 = vld [vmem:[#allocation9 + $0x280] sm:$0xff]  ;;  %v1207_v21 = vpack.c.bf16 %v409_v12, %v405_v11  ;;  %v456_v11 = vld [vmem:[#allocation9 + $0x3e8] sm:$0xff]  ;;  %v454_v12 = vld [vmem:[#allocation9 + $0x3d8] sm:$0xff] }
  0xdf   :  { %v415_v17 = vld [vmem:[#allocation9 + $0x2a0] sm:$0xff] }
  0xe0   :  { %v1115_v22 = vpack.c.bf16 %v415_v17, %v411_v16  ;;  %v455_v16 = vld [vmem:[#allocation9 + $0x3e0] sm:$0xff] }
  0xe1   :  { %1188 = vmatpush1.bf16.msra.mxu1 %v1187_v24  ;;  %1096 = vmatpush1.bf16.msra.mxu0 %v1095_v25  ;;  %v417_v24 = vld [vmem:[#allocation9 + $0x2b0] sm:$0xff]  ;;  %v1209_v25 = vpack.c.bf16 %v418_v18, %v414_v15  ;;  %v451_v15 = vld [vmem:[#allocation9 + $0x3c0] sm:$0xff] }
  0xe2   :  { %1190 = vmatprep.subr.bf16.mxu1 %v1189_v28  ;;  %1098 = vmatprep.subr.bf16.mxu0 %v1097_v29  ;;  %v419_v28 = vld [vmem:[#allocation9 + $0x2c0] sm:$0xff]  ;;  %v1211_v33 = vpack.c.bf16 %v417_v24, %v413_v23  ;;  %v1135_v18 = vpack.c.bf16 %v455_v16, %v451_v15  ;;  %v464_v23 = vld [vmem:[#allocation9 + $0x428] sm:$0xff]  ;;  %v462_v24 = vld [vmem:[#allocation9 + $0x418] sm:$0xff] }
  0xe3   :  { %v423_v29 = vld [vmem:[#allocation9 + $0x2e0] sm:$0xff]  ;;  %v488_v15 = vld [vmem:[#allocation9 + $0x4e8] sm:$0xff]  ;;  %v486_v16 = vld [vmem:[#allocation9 + $0x4d8] sm:$0xff] }
  0xe4   :  { %v1119_v34 = vpack.c.bf16 %v423_v29, %v419_v28  ;;  %v158_v28 = vlaneseq }
  0xe5   :  { %1192 = vmatpush1.bf16.msra.mxu1 %v1191_v36  ;;  %1100 = vmatpush1.bf16.msra.mxu0 %v1099_v37  ;;  %v425_v36 = vld [vmem:[#allocation9 + $0x2f0] sm:$0xff]  ;;  %v1213_v37 = vpack.c.bf16 %v426_v30, %v422_v27 }
  0xe6   :  { %1194 = vmatprep.subr.bf16.mxu1 %v1193_v40  ;;  %1102 = vmatprep.subr.bf16.mxu0 %v1101_v41  ;;  %v427_v40 = vld [vmem:[#allocation9 + $0x300] sm:$0xff]  ;;  %v1215_v45 = vpack.c.bf16 %v425_v36, %v421_v35  ;;  %v1511_v29 = vshrl.u32 %v158_v28, 7  ;;  %v494_v28 = vld [vmem:[#allocation9 + $0x518] sm:$0xff] }
  0xe7   :  { %v431_v41 = vld [vmem:[#allocation9 + $0x320] sm:$0xff] }
  0xe8   :  { %v1123_v46 = vpack.c.bf16 %v431_v41, %v427_v40  ;;  %v1514_v30 = vsub.s32 0, %v1511_v29  ;;  %v1522_v32 = vsub.s32 1, %v1511_v29  ;;  %v459_v36 = vld [vmem:[#allocation9 + $0x400] sm:$0xff]  ;;  %v461_v40 = vld [vmem:[#allocation9 + $0x410] sm:$0xff] }
  0xe9   :  { %1196 = vmatpush1.bf16.msra.mxu1 %v1195_v48  ;;  %1104 = vmatpush1.bf16.msra.mxu0 %v1103_v49  ;;  %v433_v48 = vld [vmem:[#allocation9 + $0x330] sm:$0xff]  ;;  %v1217_v49 = vpack.c.bf16 %v434_v42, %v430_v39  ;;  %v468_v42 = vld [vmem:[#allocation9 + $0x448] sm:$0xff] }
  0xea   :  { %1198 = vmatprep.subr.bf16.mxu1 %v1197_v52  ;;  %1106 = vmatprep.subr.bf16.mxu0 %v1105_v53  ;;  %v435_v52 = vld [vmem:[#allocation9 + $0x340] sm:$0xff]  ;;  %v1219_v57 = vpack.c.bf16 %v433_v48, %v429_v47  ;;  %v465_v41 = vld [vmem:[#allocation9 + $0x430] sm:$0xff]  ;;  %v1141_v55 = vpack.c.bf16 %v472_v44, %v468_v42  ;;  %v500_v42 = vld [vmem:[#allocation9 + $0x548] sm:$0xff] }
  0xeb   :  { %v439_v53 = vld [vmem:[#allocation9 + $0x360] sm:$0xff]  ;;  %v502_v44 = vld [vmem:[#allocation9 + $0x558] sm:$0xff] }
  0xec   :  { %v1127_v58 = vpack.c.bf16 %v439_v53, %v435_v52 }
  0xed   :  { %1200 = vmatpush1.bf16.msra.mxu1 %v1199_v60  ;;  %1108 = vmatpush1.bf16.msra.mxu0 %v1107_v61  ;;  %v1221_v60 = vpack.c.bf16 %v442_v54, %v438_v51  ;;  %v441_v61 = vld [vmem:[#allocation9 + $0x370] sm:$0xff]  ;;  %v471_v51 = vld [vmem:[#allocation9 + $0x460] sm:$0xff] }
  0xee   :  { %1202 = vmatprep.subr.bf16.mxu1 %v1201_v0  ;;  %1110 = vmatprep.subr.bf16.mxu0 %v1109_v2  ;;  %v447_v0 = vld [vmem:[#allocation9 + $0x3a0] sm:$0xff]  ;;  %v446_v2 = vld [vmem:[#allocation9 + $0x398] sm:$0xff]  ;;  %v1223_v4 = vpack.c.bf16 %v441_v61, %v437_v59  ;;  %v476_v59 = vld [vmem:[#allocation9 + $0x488] sm:$0xff] }
  0xef   :  { %v1131_v5 = vpack.c.bf16 %v447_v0, %v443_v63  ;;  %v1225_v6 = vpack.c.bf16 %v450_v3, %v446_v2  ;;  %v480_v63 = vld [vmem:[#allocation9 + $0x4a8] sm:$0xff]  ;;  %v478_v0 = vld [vmem:[#allocation9 + $0x498] sm:$0xff] }
  0xf0   :  { %v482_v2 = vld [vmem:[#allocation9 + $0x4b8] sm:$0xff] }
  0xf1   :  { %1204 = vmatpush1.bf16.msra.mxu1 %v1203_v9  ;;  %1112 = vmatpush1.bf16.msra.mxu0 %v1111_v10  ;;  %v1227_v9 = vpack.c.bf16 %v449_v8, %v445_v7  ;;  %v452_v10 = vld [vmem:[#allocation9 + $0x3c8] sm:$0xff]  ;;  %v475_v7 = vld [vmem:[#allocation9 + $0x480] sm:$0xff] }
  0xf2   :  { %1206 = vmatprep.subr.bf16.mxu1 %v1205_v13  ;;  %1114 = vmatprep.subr.bf16.mxu0 %v1113_v14  ;;  %v1133_v13 = vpack.c.bf16 %v456_v11, %v452_v10  ;;  %v458_v14 = vld [vmem:[#allocation9 + $0x3f8] sm:$0xff]  ;;  %v479_v8 = vld [vmem:[#allocation9 + $0x4a0] sm:$0xff]  ;;  %v1145_v10 = vpack.c.bf16 %v480_v63, %v476_v59  ;;  %v1241_v11 = vpack.c.bf16 %v482_v2, %v478_v0  ;;  %v168_v0 = vsub.s32 2, %v1511_v29 }
  0xf3   :  { %v1229_v17 = vpack.c.bf16 %v458_v14, %v454_v12  ;;  %v477_v12 = vld [vmem:[#allocation9 + $0x490] sm:$0xff]  ;;  %v484_v14 = vld [vmem:[#allocation9 + $0x4c8] sm:$0xff]  ;;  %v511_v63 = vld [vmem:[#allocation9 + $0x5a0] sm:$0xff] }
  0xf5   :  { %1208 = vmatpush1.bf16.msra.mxu1 %v1207_v21  ;;  %1116 = vmatpush1.bf16.msra.mxu0 %v1115_v22  ;;  %v1231_v21 = vpack.c.bf16 %v457_v20, %v453_v19  ;;  %v460_v22 = vld [vmem:[#allocation9 + $0x408] sm:$0xff]  ;;  %v483_v20 = vld [vmem:[#allocation9 + $0x4c0] sm:$0xff] }
  0xf6   :  { %1210 = vmatprep.subr.bf16.mxu1 %v1209_v25  ;;  %1118 = vmatprep.subr.bf16.mxu0 %v1117_v26  ;;  %v1137_v25 = vpack.c.bf16 %v464_v23, %v460_v22  ;;  %v466_v26 = vld [vmem:[#allocation9 + $0x438] sm:$0xff]  ;;  %v1149_v22 = vpack.c.bf16 %v488_v15, %v484_v14 }
  0xf7   :  { %v1233_v27 = vpack.c.bf16 %v466_v26, %v462_v24  ;;  %v485_v24 = vld [vmem:[#allocation9 + $0x4d0] sm:$0xff]  ;;  %v492_v26 = vld [vmem:[#allocation9 + $0x508] sm:$0xff] }
  0xf9   :  { %1212 = vmatpush1.bf16.msra.mxu1 %v1211_v33  ;;  %1120 = vmatpush1.bf16.msra.mxu0 %v1119_v34  ;;  %v161_v33 = vrot.slane %v1519_v31, %v1514_v30  ;;  %v165_v34 = vrot.slane %v1519_v31, %v1522_v32 }
  0xfa   :  { %1214 = vmatprep.subr.bf16.mxu1 %v1213_v37  ;;  %1122 = vmatprep.subr.bf16.mxu0 %v1121_v38  ;;  %v463_v37 = vld [vmem:[#allocation9 + $0x420] sm:$0xff] }
  0xfb   :  { %v1139_v48 = vpack.c.bf16 %v463_v37, %v459_v36  ;;  %v491_v36 = vld [vmem:[#allocation9 + $0x500] sm:$0xff] }
  0xfc   :  { %v495_v37 = vld [vmem:[#allocation9 + $0x520] sm:$0xff] }
  0xfd   :  { %1216 = vmatpush1.bf16.msra.mxu1 %v1215_v45  ;;  %1124 = vmatpush1.bf16.msra.mxu0 %v1123_v46  ;;  %v470_v45 = vld [vmem:[#allocation9 + $0x458] sm:$0xff] }
  0xfe   :  { %1218 = vmatprep.subr.bf16.mxu1 %v1217_v49  ;;  %1126 = vmatprep.subr.bf16.mxu0 %v1125_v50  ;;  %v474_v46 = vld [vmem:[#allocation9 + $0x478] sm:$0xff]  ;;  %v1235_v49 = vpack.c.bf16 %v465_v41, %v461_v40  ;;  %v467_v50 = vld [vmem:[#allocation9 + $0x440] sm:$0xff]  ;;  %v493_v40 = vld [vmem:[#allocation9 + $0x510] sm:$0xff] }
  0xff   :  { %v1237_v56 = vpack.c.bf16 %v474_v46, %v470_v45  ;;  %v497_v41 = vld [vmem:[#allocation9 + $0x530] sm:$0xff]  ;;  %v506_v45 = vld [vmem:[#allocation9 + $0x578] sm:$0xff]  ;;  %v1155_v46 = vpack.c.bf16 %v495_v37, %v491_v36 }
 0x101   :  { %1220 = vmatpush1.bf16.msra.mxu1 %v1219_v57  ;;  %1128 = vmatpush1.bf16.msra.mxu0 %v1127_v58  ;;  %v469_v57 = vld [vmem:[#allocation9 + $0x450] sm:$0xff] }
 0x102   :  { %1222 = vmatprep.subr.bf16.mxu1 %v1221_v60  ;;  %1130 = vmatprep.subr.bf16.mxu0 %v1129_v62  ;;  %v473_v58 = vld [vmem:[#allocation9 + $0x470] sm:$0xff] }
 0x105   :  { %1224 = vmatpush1.bf16.msra.mxu1 %v1223_v4  ;;  %1132 = vmatpush1.bf16.msra.mxu0 %v1131_v5  ;;  %v1143_v5 = vpack.c.bf16 %v471_v51, %v467_v50  ;;  %v1253_v51 = vpack.c.bf16 %v506_v45, %v502_v44 }
 0x106   :  { %1226 = vmatprep.subr.bf16.mxu1 %v1225_v6  ;;  %1134 = vmatprep.subr.bf16.mxu0 %v1133_v13  ;;  %v1239_v6 = vpack.c.bf16 %v473_v58, %v469_v57  ;;  %v481_v13 = vld [vmem:[#allocation9 + $0x4b0] sm:$0xff]  ;;  %v510_v57 = vld [vmem:[#allocation9 + $0x598] sm:$0xff] }
 0x107   :  { %v1243_v19 = vpack.c.bf16 %v481_v13, %v477_v12  ;;  %v514_v58 = vld [vmem:[#allocation9 + $0x5b8] sm:$0xff]  ;;  %v515_v12 = vld [vmem:[#allocation9 + $0x5c0] sm:$0xff]  ;;  %v169_v13 = vrot.slane %v1519_v31, %v168_v0 }
 0x109   :  { %1228 = vmatpush1.bf16.msra.mxu1 %v1227_v9  ;;  %1136 = vmatpush1.bf16.msra.mxu0 %v1135_v18  ;;  %v1147_v18 = vpack.c.bf16 %v479_v8, %v475_v7  ;;  %v520_v7 = vld [vmem:[#allocation9 + $0x5e8] sm:$0xff]  ;;  %v518_v8 = vld [vmem:[#allocation9 + $0x5d8] sm:$0xff] }
 0x10a   :  { %1230 = vmatprep.subr.bf16.mxu1 %v1229_v17  ;;  %1138 = vmatprep.subr.bf16.mxu0 %v1137_v25  ;;  %v490_v17 = vld [vmem:[#allocation9 + $0x4f8] sm:$0xff]  ;;  %v489_v25 = vld [vmem:[#allocation9 + $0x4f0] sm:$0xff] }
 0x10b   :  { %v1245_v23 = vpack.c.bf16 %v490_v17, %v486_v16  ;;  %v519_v16 = vld [vmem:[#allocation9 + $0x5e0] sm:$0xff]  ;;  %v517_v17 = vld [vmem:[#allocation9 + $0x5d0] sm:$0xff] }
 0x10d   :  { %1232 = vmatpush1.bf16.msra.mxu1 %v1231_v21  ;;  %v487_v21 = vld [vmem:[#allocation9 + $0x4e0] sm:$0xff] }
 0x10e   :  { %1234 = vmatprep.subr.bf16.mxu1 %v1233_v27  ;;  %v496_v27 = vld [vmem:[#allocation9 + $0x528] sm:$0xff] }
 0x19f   :  { %v239_v35 = vpop.f32.mrb[0].mxu0 }
 0x1a0   :  { %v240_v38 = vadd.f32 %v239_v35, %v161_v33  ;;  %v241_v39 = vpop.f32.mrb[1].mxu0  ;;  %v1247_v35 = vpack.c.bf16 %v489_v25, %v485_v24  ;;  %v539_v24 = vsub.s32 3, %v1511_v29 }
 0x1a1   :  { %v242_v43 = vadd.f32 %v241_v39, %v165_v34 }
 0x1a2   :  { %v325_v54 = vmax.f32 %v240_v38, 0.0  ;;  %v1153_v38 = vpack.c.bf16 %v496_v27, %v492_v26 }
 0x1a3   :  { %v326_v47 = vmax.f32 %v242_v43, 0.0  ;;  %v245_v52 = vpop.f32.mrb[2].mxu0  ;;  %v1528_v53 = vpop.f32.mrb[0].mxu1  ;;  %v504_v43 = vld [vmem:[#allocation9 + $0x568] sm:$0xff] }
 0x1a4   :  { %v246_v60 = vadd.f32 %v245_v52, %v161_v33  ;;  %v247_v61 = vpop.f32.mrb[3].mxu0  ;;  %v1530_v62 = vpop.f32.mrb[1].mxu1  ;;  %v498_v33 = vld [vmem:[#allocation9 + $0x538] sm:$0xff]  ;;  %v1157_v50 = vpack.c.bf16 %v504_v43, %v500_v42  ;;  %v501_v52 = vld [vmem:[#allocation9 + $0x550] sm:$0xff] }
 0x1a5   :  { %609 = vmatprep.mubr.f32.mxu0 %v326_v47  ;;  %763 = vmatprep.mubr.f32.mxu1 %v326_v47  ;;  %v248_v3 = vadd.f32 %v247_v61, %v165_v34  ;;  %v1151_v34 = vpack.c.bf16 %v487_v21, %v483_v20  ;;  %v1249_v39 = vpack.c.bf16 %v498_v33, %v494_v28  ;;  %v507_v61 = vld [vmem:[#allocation9 + $0x580] sm:$0xff] }
 0x1a6   :  { %610 = vmatmul.mubr.f32.vlgmr.msra.gmra.mrb[4].mxu0 %v325_v54  ;;  %764 = vmatmul.mubr.f32.vlgmr.msra.gmra.mrb[2].mxu1 %v325_v54  ;;  %v328_v4 = vmax.f32 %v246_v60, 0.0  ;;  %v1251_v47 = vpack.c.bf16 %v497_v41, %v493_v40  ;;  %v505_v54 = vld [vmem:[#allocation9 + $0x570] sm:$0xff]  ;;  %v317_v21 = vadd.f32 %v1530_v62, %v169_v13 }
 0x1a7   :  { %1140 = vmatpush1.bf16.msra.mxu0 %v1139_v48  ;;  %1236 = vmatpush1.bf16.msra.mxu1 %v1235_v49  ;;  %v329_v9 = vmax.f32 %v248_v3, 0.0  ;;  %v499_v48 = vld [vmem:[#allocation9 + $0x540] sm:$0xff]  ;;  %v1255_v60 = vpack.c.bf16 %v505_v54, %v501_v52  ;;  %v1257_v3 = vpack.c.bf16 %v514_v58, %v510_v57  ;;  %v523_v62 = vld [vmem:[%s1559_s5] sm:$0xf] }
 0x1a8   :  { %1142 = vmatprep.subr.bf16.mxu0 %v1141_v55  ;;  %1238 = vmatprep.subr.bf16.mxu1 %v1237_v56  ;;  %v503_v49 = vld [vmem:[#allocation9 + $0x560] sm:$0xff]  ;;  %v508_v55 = vld [vmem:[#allocation9 + $0x588] sm:$0xff]  ;;  %v327_v31 = vmax.f32 %v317_v21, 0.0  ;;  %v528_v25 = vrot.slane %v523_v62, %v1514_v30  ;;  %v536_v26 = vrot.slane %v523_v62, %v168_v0  ;;  %v532_v27 = vrot.slane %v523_v62, %v1522_v32 }
 0x1a9   :  { %615 = vmatprep.mubr.f32.mxu0 %v329_v9  ;;  %769 = vmatprep.mubr.f32.mxu1 %v329_v9  ;;  %v512_v56 = vld [vmem:[#allocation9 + $0x5a8] sm:$0xff]  ;;  %v1159_v59 = vpack.c.bf16 %v503_v49, %v499_v48  ;;  %v522_v9 = vld [vmem:[#allocation9 + $0x5f8] sm:$0xff]  ;;  %v540_v28 = vrot.slane %v523_v62, %v539_v24 }
 0x1aa   :  { %616 = vmatmul.mubr.f32.gmra.mrb[6].mxu0 %v328_v4  ;;  %770 = vmatmul.mubr.f32.gmra.mrb[4].mxu1 %v328_v4  ;;  %v1161_v2 = vpack.c.bf16 %v512_v56, %v508_v55  ;;  %v509_v4 = vld [vmem:[#allocation9 + $0x590] sm:$0xff]  ;;  %v1261_v15 = vpack.c.bf16 %v522_v9, %v518_v8 }
 0x1ab   :  { %1144 = vmatpush1.bf16.msra.mxu0 %v1143_v5  ;;  %1240 = vmatpush1.bf16.msra.mxu1 %v1239_v6  ;;  %v513_v5 = vld [vmem:[#allocation9 + $0x5b0] sm:$0xff]  ;;  %v516_v6 = vld [vmem:[#allocation9 + $0x5c8] sm:$0xff] }
 0x1ac   :  { %1146 = vmatprep.subr.bf16.mxu0 %v1145_v10  ;;  %1242 = vmatprep.subr.bf16.mxu1 %v1241_v11  ;;  %v1163_v10 = vpack.c.bf16 %v511_v63, %v507_v61  ;;  %v1259_v11 = vpack.c.bf16 %v513_v5, %v509_v4  ;;  %v1165_v14 = vpack.c.bf16 %v520_v7, %v516_v6 }
 0x1ad   :  { %686 = vmatprep.mubr.f32.mxu0 %v1395_v1  ;;  %840 = vmatprep.mubr.f32.mxu1 %v1395_v1 }
 0x1af   :  { %1148 = vmatpush1.bf16.msra.mxu0 %v1147_v18  ;;  %1244 = vmatpush1.bf16.msra.mxu1 %v1243_v19  ;;  %v521_v18 = vld [vmem:[#allocation9 + $0x5f0] sm:$0xff]  ;;  %v1167_v19 = vpack.c.bf16 %v519_v16, %v515_v12 }
 0x1b0   :  { %1150 = vmatprep.subr.bf16.mxu0 %v1149_v22  ;;  %1246 = vmatprep.subr.bf16.mxu1 %v1245_v23  ;;  %v1263_v20 = vpack.c.bf16 %v521_v18, %v517_v17  ;;  %v322_v22 = vadd.f32 %v1528_v53, %v169_v13  ;;  %v861_v53 = vld [vmem:[%s1560_s6] sm:$0xf] }
 0x1b1   :  { %v870_v29 = vrot.slane %v861_v53, %v1522_v32  ;;  %v874_v43 = vrot.slane %v861_v53, %v168_v0  ;;  %v878_v52 = vrot.slane %v861_v53, %v539_v24 }
 0x1b2   :  { %v330_v23 = vmax.f32 %v322_v22, 0.0 }
 0x1b3   :  { %1152 = vmatpush1.bf16.msra.mxu0 %v1151_v34  ;;  %1248 = vmatpush1.bf16.msra.mxu1 %v1247_v35  ;;  %v866_v35 = vrot.slane %v861_v53, %v1514_v30 }
 0x1b4   :  { %1154 = vmatprep.subr.bf16.mxu0 %v1153_v38  ;;  %1250 = vmatprep.subr.bf16.mxu1 %v1249_v39 }
 0x1b7   :  { %1156 = vmatpush1.bf16.msra.mxu0 %v1155_v46  ;;  %1252 = vmatpush1.bf16.msra.mxu1 %v1251_v47 }
 0x1b8   :  { %1158 = vmatprep.subr.bf16.mxu0 %v1157_v50  ;;  %1254 = vmatprep.subr.bf16.mxu1 %v1253_v51 }
 0x1bb   :  { %1160 = vmatpush1.bf16.msra.mxu0 %v1159_v59  ;;  %1256 = vmatpush1.bf16.msra.mxu1 %v1255_v60 }
 0x1bc   :  { %1162 = vmatprep.subr.bf16.mxu0 %v1161_v2  ;;  %1258 = vmatprep.subr.bf16.mxu1 %v1257_v3 }
 0x1bf   :  { %1164 = vmatpush1.bf16.msra.mxu0 %v1163_v10  ;;  %1260 = vmatpush1.bf16.msra.mxu1 %v1259_v11  ;;  %v955_v10 = vld [vmem:[#allocation3] ss:$0 sm:$0xff] }
 0x1c0   :  { %1166 = vmatprep.subr.bf16.mxu0 %v1165_v14  ;;  %1262 = vmatprep.subr.bf16.mxu1 %v1261_v15 }
 0x1c3   :  { %1168 = vmatpush1.bf16.msra.mxu0 %v1167_v19  ;;  %1264 = vmatpush1.bf16.msra.mxu1 %v1263_v20 }
 0x1c6   :  { %687 = vmatmul.mubr.f32.vlgmr.msra.gmra.mrb[4].mxu0 %v327_v31  ;;  %841 = vmatmul.mubr.f32.vlgmr.msra.gmra.mrb[2].mxu1 %v327_v31 }
 0x1c7   :  { %692 = vmatprep.mubr.f32.mxu0 %v1395_v1  ;;  %846 = vmatprep.mubr.f32.mxu1 %v1395_v1 }
 0x1ca   :  { %693 = vmatmul.mubr.f32.gmra.mrb[6].mxu0 %v330_v23  ;;  %847 = vmatmul.mubr.f32.gmra.mrb[4].mxu1 %v330_v23 }
 0x299   :  { %v688_v1 = vpop.f32.mrb[4].mxu0  ;;  %v842_v33 = vpop.f32.mrb[2].mxu1 }
 0x29a   :  { %v1265_v34 = vadd.f32 %v688_v1, %v528_v25  ;;  %v1269_v36 = vadd.f32 %v842_v33, %v536_v26  ;;  %v690_v37 = vpop.f32.mrb[5].mxu0  ;;  %v844_v38 = vpop.f32.mrb[3].mxu1 }
 0x29b   :  { %v1266_v39 = vadd.f32 %v690_v37, %v532_v27  ;;  %v1270_v40 = vadd.f32 %v844_v38, %v540_v28 }
 0x29c   :  { %v853_v41 = vmax.f32 %v1265_v34, 0.0  ;;  %v855_v42 = vmax.f32 %v1269_v36, 0.0 }
 0x29d   :  { %v854_v44 = vmax.f32 %v1266_v39, 0.0  ;;  %v694_v45 = vpop.f32.mrb[6].mxu0  ;;  %v848_v46 = vpop.f32.mrb[4].mxu1  ;;  %v856_v54 = vmax.f32 %v1270_v40, 0.0 }
 0x29e   :  { %v883_v47 = vmul.f32 %v866_v35, %v853_v41  ;;  %v1267_v48 = vadd.f32 %v694_v45, %v528_v25  ;;  %v1271_v49 = vadd.f32 %v848_v46, %v536_v26  ;;  %v696_v50 = vpop.f32.mrb[7].mxu0  ;;  %v850_v51 = vpop.f32.mrb[5].mxu1  ;;  %v885_v58 = vmul.f32 %v874_v43, %v855_v42 }
 0x29f   :  { %v884_v30 = vmul.f32 %v870_v29, %v854_v44  ;;  %v1268_v55 = vadd.f32 %v696_v50, %v532_v27  ;;  %v1272_v56 = vadd.f32 %v850_v51, %v540_v28  ;;  %v886_v2 = vmul.f32 %v878_v52, %v856_v54 }
 0x2a0   :  { %v857_v57 = vmax.f32 %v1267_v48, 0.0  ;;  %v859_v32 = vmax.f32 %v1271_v49, 0.0 }
 0x2a1   :  { %v858_v59 = vmax.f32 %v1268_v55, 0.0  ;;  %v891_v60 = vadd.f32 %v884_v30, %v883_v47  ;;  %v860_v0 = vmax.f32 %v1272_v56, 0.0 }
 0x2a2   :  { %v887_v61 = vmul.f32 %v866_v35, %v857_v57  ;;  %v889_v4 = vmul.f32 %v874_v43, %v859_v32 }
 0x2a3   :  { %v888_v63 = vmul.f32 %v870_v29, %v858_v59  ;;  %v892_v3 = vadd.f32 %v891_v60, %v885_v58  ;;  %v890_v7 = vmul.f32 %v878_v52, %v860_v0 }
 0x2a5   :  { %v896_v5 = vadd.f32 %v888_v63, %v887_v61  ;;  %v893_v6 = vadd.f32 %v892_v3, %v886_v2 }
 0x2a7   :  { %894 = vadd.xlane.f32.xlu1 %v893_v6  ;;  %v897_v8 = vadd.f32 %v896_v5, %v889_v4 }
 0x2a9   :  { %v898_v9 = vadd.f32 %v897_v8, %v890_v7 }
 0x2ab   :  { %899 = vadd.xlane.f32.xlu1 %v898_v9 }
 0x334   :  { %v895_v11 = vpop.xlane.xlu1 %894 }
 0x335   :  { %v908_v12 = vadd.f32 %v955_v10, %v895_v11 }
 0x337   :  { %911 = vst.msk [vmem:[#allocation11] sm:$0xff] %vm910_vm2, %v908_v12 }
 0x338   :  { %v900_v13 = vpop.xlane.xlu1 %899 }
 0x33e   :  { %v930_v14 = vld [vmem:[#allocation11] sm:$0x3] }
 0x33f   :  { %931 = vst [vmem:[%s1562_s8] sm:$0x3] %v930_v14 }
 0x340   :  { %948 = vsyncpa [#allocation5], 1 }
 0x341   :  { %949 = vsyncpa [#allocation7], 1 }
 0x342   :  { %950 = vsyncpa [#allocation10], 1 }

</bundles_post_ra>
